<compile_context>
chip_gen: v5e
topology: v5e:2x2
jax: 0.10.0
libtpu: 0.0.40
codegen_flags: <defaults>
</compile_context>

<pallas_src>
import jax
import jax.numpy as jnp
import numpy as np
from jax.experimental import pallas as pl
from jax.experimental.pallas import tpu as pltpu  # noqa: F401  (TPU backend)


# ----------------------------------------------------------------------------
# Host-side weight packing: one contiguous (R, 128) VMEM slab
# ----------------------------------------------------------------------------
def _pack_weights(tensors):
    """Pack name->2D f32 arrays into one (R, 128) slab.

    Every item starts at lane 0 and at a row offset that is a multiple of 8,
    so in-kernel static slices are cheap aligned loads.
    Returns (slab, layout) with layout[name] = (row0, rows, cols).
    """
    LANES = 128
    layout = {}
    blocks = []
    row = 0
    for name, t in tensors.items():
        t = jnp.asarray(t, jnp.float32)
        r, c = t.shape
        r_pad = -(-r // 8) * 8                     # round rows up to sublanes
        blk = jnp.zeros((r_pad, LANES), jnp.float32).at[:r, :c].set(t)
        layout[name] = (row, r, c)
        blocks.append(blk)
        row += r_pad
    return jnp.concatenate(blocks, axis=0), layout


# ----------------------------------------------------------------------------
# Fused forward kernel (transposed / lane-dense orientation)
# ----------------------------------------------------------------------------
def _make_kernel(layout):
    def kernel(at_ref, xt_ref, keep_ref, pt_ref, w_ref, actor_ref, critic_ref):
        f32 = jnp.float32

        def W(name):
            r0, r, c = layout[name]
            return w_ref[r0:r0 + r, 0:c]           # static slice of the slab

        def dot(a, b):
            return jnp.dot(a, b, preferred_element_type=f32)

        AT = at_ref[...]          # (N, N): A^T, A[i,j] = 1/deg_in(i) for j->i
        xT = xt_ref[...]          # (Fin_pad, N) node features, transposed

        # conv_first: h = tanh(Wl @ mean_agg + Wr @ x + b)   (transposed form)
        aggT = dot(xT, AT)                                             # (F, N)
        hT = jnp.tanh(dot(W("w1l"), aggT) + dot(W("w1r"), xT) + W("b1"))

        # conv_common[0]
        aggT = dot(hT, AT)
        hT = jnp.tanh(dot(W("w2l"), aggT) + dot(W("w2r"), hT) + W("b2"))

        # actor0 / critic0 share one pass over AT (x.detach() is a fwd no-op)
        aggT = dot(hT, AT)
        critT = dot(W("wcl"), aggT) + dot(W("wcr"), hT) + W("bc")  # (units, N)
        actor = dot(W("wal"), aggT) + dot(W("war"), hT) + W("ba")  # (1, N)

        # masked log_softmax over all nodes (lane axis).  Finite sentinel keeps
        # the max well-defined; masked lanes come out exactly -inf.  If every
        # node were masked, s == 0 makes logp +inf pre-select, but the final
        # where() still yields -inf everywhere (no NaN).
        keep = keep_ref[...] > 0.0                                  # (1, N)
        neg_big = jnp.float32(-1e30)
        mx = jnp.max(jnp.where(keep, actor, neg_big), axis=-1, keepdims=True)
        e = jnp.where(keep, jnp.exp(actor - mx), 0.0)
        s = jnp.sum(e, axis=-1, keepdims=True)
        logp = actor - mx - jnp.log(s)
        actor_ref[...] = jnp.where(keep, logp, -jnp.inf)

        # critic head: global_mean_pool commutes with the final Linear (pool
        # rows sum to 1; no activation after critic0 in the reference), so
        # pool first (wide contraction), then units->1 projection, then tanh.
        pooledT = dot(critT, pt_ref[...])                           # (units, G)
        critic_ref[...] = jnp.tanh(dot(W("wf"), pooledT) + W("bf"))  # (1, G)

    return kernel


def model_forward(slab, layout, xT, AT, PT, keep_row):
    """Training-mode forward: returns (x_actor [N,1], x_critic [G,1])."""
    fin_pad, N = xT.shape
    G = PT.shape[1]

    def full(shape):
        return pl.BlockSpec(shape, lambda: (0,) * len(shape))

    actor_row, critic_row = pl.pallas_call(
        _make_kernel(layout),
        out_shape=(jax.ShapeDtypeStruct((1, N), jnp.float32),
                   jax.ShapeDtypeStruct((1, G), jnp.float32)),
        in_specs=[
            full((N, N)),          # AT
            full((fin_pad, N)),    # xT
            full((1, N)),          # keep mask (row)
            full((N, G)),          # PT
            full(slab.shape),      # packed weight slab (single DMA)
        ],
        out_specs=(full((1, N)), full((1, G))),
    )(AT, xT, keep_row, PT, slab)
    # lane-dense (1,N)/(1,G) kernel outputs; present as (N,1)/(G,1) like torch.
    return actor_row.reshape(N, 1), critic_row.reshape(G, 1)


# ----------------------------------------------------------------------------
# Parameter init (torch_geometric SAGEConv form) + host-side fusion/packing
# ----------------------------------------------------------------------------
def init_params(key, units, fin=7):
    ks = jax.random.split(key, 12)

    def w(k, shape):
        return 0.1 * jax.random.normal(k, shape, jnp.float32)

    def sage(k0, k1, k2, f_in, f_out):
        # (Wl: mean-aggregated neighbors, Wr: root, bias) -- matches SAGEConv
        return (w(k0, (f_in, f_out)), w(k1, (f_in, f_out)), w(k2, (1, f_out)))

    return {
        "first":   sage(ks[0],  ks[1],  ks[2],  fin,   units),
        "common0": sage(ks[3],  ks[4],  ks[5],  units, units),
        "actor0":  sage(ks[6],  ks[7],  ks[8],  units, 1),
        "critic0": sage(ks[9],  ks[10], ks[11], units, units),
        "final_w": w(jax.random.fold_in(key, 100), (units, 1)),
        "final_b": w(jax.random.fold_in(key, 101), (1, 1)),
    }


def fuse_params(params, fin_pad):
    """Transpose every weight to the (out, in) kernel orientation and pack."""
    wl1, wr1, b1 = params["first"]
    wl2, wr2, b2 = params["common0"]
    wla, wra, ba = params["actor0"]
    wlc, wrc, bc = params["critic0"]
    wf, bf = params["final_w"], params["final_b"]

    def pad_in(wT):  # (u, fin) -> (u, fin_pad); padded input column is zero
        u, f = wT.shape
        return jnp.pad(wT, ((0, 0), (0, fin_pad - f)))

    tensors = {
        "w1l": pad_in(wl1.T), "w1r": pad_in(wr1.T),      # (units, fin_pad)
        "w2l": wl2.T, "w2r": wr2.T,                      # (units, units)
        "wcl": wlc.T, "wcr": wrc.T,                      # (units, units)
        "wal": wla.T, "war": wra.T,                      # (1, units)
        "wf":  wf.T,                                     # (1, units)
        "b1":  b1.T,  "b2": b2.T, "bc": bc.T,            # (units, 1)
        "ba":  ba.T,  "bf": bf.T,                        # (1, 1)
    }
    return _pack_weights(tensors)


# ----------------------------------------------------------------------------
# Deterministic setup
# ----------------------------------------------------------------------------
if __name__ == "__main__":
    units = 32
    num_graphs = 2
    nodes_per_graph = 8
    N = num_graphs * nodes_per_graph
    fin, fin_pad = 7, 8

    key = jax.random.PRNGKey(0)
    kx, _ = jax.random.split(key)

    # node features [N, 7]; columns 3 and 4 carry the "do_not_flip" flags
    x = jax.random.normal(kx, (N, fin), jnp.float32)
    x = x.at[:, 3].set(jnp.where(jnp.arange(N) % 4 == 0, 1.0, 0.0))
    x = x.at[:, 4].set(jnp.where(jnp.arange(N) % 5 == 0, 1.0, 0.0))

    # bidirectional ring graph within each of the 2 graphs
    src, dst = [], []
    for g in range(num_graphs):
        off = g * nodes_per_graph
        for i in range(nodes_per_graph):
            j = (i + 1) % nodes_per_graph
            src += [off + i, off + j]
            dst += [off + j, off + i]
    edge_index = np.array([src, dst], dtype=np.int32)
    batch = np.repeat(np.arange(num_graphs), nodes_per_graph).astype(np.int32)

    # dense mean-aggregation matrix A [N, N]: A[i, j] = 1/deg_in(i) for j->i
    A_np = np.zeros((N, N), np.float32)
    for s, d in zip(edge_index[0], edge_index[1]):
        A_np[d, s] += 1.0
    deg = A_np.sum(axis=1, keepdims=True)
    A_np = A_np / np.maximum(deg, 1.0)

    # global_mean_pool matrix P [G, N] (rows sum to 1)
    P_np = np.zeros((num_graphs, N), np.float32)
    for i, b in enumerate(batch):
        P_np[b, i] = 1.0
    P_np = P_np / P_np.sum(axis=1, keepdims=True)

    # do_not_flip masks: nodes with x[:,3]!=0 or x[:,4]!=0 get -inf logits
    keep = ((x[:, 3] == 0.0) & (x[:, 4] == 0.0)).astype(jnp.float32)

    # transposed, lane-dense kernel operands (nodes on the lane axis)
    xT = jnp.concatenate([x, jnp.zeros((N, fin_pad - fin), jnp.float32)], 1).T
    AT = jnp.asarray(A_np).T                 # (N, N)
    PT = jnp.asarray(P_np).T                 # (N, G)
    keep_row = keep[None, :]                 # (1, N)

    params = init_params(jax.random.PRNGKey(42), units, fin=fin)
    slab, layout = fuse_params(params, fin_pad)

    x_actor, x_critic = model_forward(slab, layout, xT, AT, PT, keep_row)
    jax.block_until_ready(x_actor)
    jax.block_until_ready(x_critic)

    assert x_actor.shape == (N, 1)
    assert x_critic.shape == (num_graphs, 1)
    # masked rows must be -inf; unmasked log-probs must sum to ~1
    finite = jnp.isfinite(x_actor[:, 0])
    assert bool(jnp.all(~finite | (keep > 0)))
    assert bool(jnp.all(finite | (keep == 0)))
    prob_sum = float(jnp.sum(jnp.where(finite, jnp.exp(x_actor[:, 0]), 0.0)))
    assert abs(prob_sum - 1.0) < 1e-4
    assert bool(jnp.all(jnp.abs(x_critic) <= 1.0))
    assert not bool(jnp.any(jnp.isnan(x_critic)))

    print("KERNEL_OK")
</pallas_src>

<mosaic_0001>
module attributes {stable_mosaic.version = 11 : i64} {
  func.func @kernel(%arg0: memref<16x16xf32, #tpu.memory_space<vmem>>, %arg1: memref<8x16xf32, #tpu.memory_space<vmem>>, %arg2: memref<1x16xf32, #tpu.memory_space<vmem>>, %arg3: memref<16x2xf32, #tpu.memory_space<vmem>>, %arg4: memref<328x128xf32, #tpu.memory_space<vmem>>, %arg5: memref<1x16xf32, #tpu.memory_space<vmem>>, %arg6: memref<1x2xf32, #tpu.memory_space<vmem>>) attributes {dimension_semantics = [], scalar_prefetch = 0 : i64, scratch_operands = 0 : i64, tpu.core_type = #tpu.core_type<tc>} {
    %c0 = arith.constant 0 : index
    %c0_0 = arith.constant 0 : index
    %0 = vector.load %arg0[%c0, %c0_0] : memref<16x16xf32, #tpu.memory_space<vmem>>, vector<16x16xf32>
    %c0_1 = arith.constant 0 : index
    %c0_2 = arith.constant 0 : index
    %1 = vector.load %arg1[%c0_1, %c0_2] : memref<8x16xf32, #tpu.memory_space<vmem>>, vector<8x16xf32>
    %cst = arith.constant dense<0.000000e+00> : vector<8x16xf32>
    %2 = tpu.matmul %1, %0, %cst {dimension_numbers = #tpu.dot_dimension_numbers<[1], [0], [0], [1], [0, 0, 1, 1], [], []>} : vector<8x16xf32>, vector<16x16xf32>, vector<8x16xf32> -> vector<8x16xf32>
    %c0_3 = arith.constant 0 : index
    %c0_4 = arith.constant 0 : index
    %3 = vector.load %arg4[%c0_3, %c0_4] : memref<328x128xf32, #tpu.memory_space<vmem>>, vector<32x8xf32>
    %cst_5 = arith.constant dense<0.000000e+00> : vector<32x16xf32>
    %4 = tpu.matmul %3, %2, %cst_5 {dimension_numbers = #tpu.dot_dimension_numbers<[1], [0], [0], [1], [0, 0, 1, 1], [], []>} : vector<32x8xf32>, vector<8x16xf32>, vector<32x16xf32> -> vector<32x16xf32>
    %c32 = arith.constant 32 : index
    %c0_6 = arith.constant 0 : index
    %5 = vector.load %arg4[%c32, %c0_6] : memref<328x128xf32, #tpu.memory_space<vmem>>, vector<32x8xf32>
    %cst_7 = arith.constant dense<0.000000e+00> : vector<32x16xf32>
    %6 = tpu.matmul %5, %1, %cst_7 {dimension_numbers = #tpu.dot_dimension_numbers<[1], [0], [0], [1], [0, 0, 1, 1], [], []>} : vector<32x8xf32>, vector<8x16xf32>, vector<32x16xf32> -> vector<32x16xf32>
    %7 = arith.addf %4, %6 : vector<32x16xf32>
    %c216 = arith.constant 216 : index
    %c0_8 = arith.constant 0 : index
    %8 = vector.load %arg4[%c216, %c0_8] : memref<328x128xf32, #tpu.memory_space<vmem>>, vector<32x1xf32>
    %9 = vector.broadcast %8 : vector<32x1xf32> to vector<32x16xf32>
    %10 = arith.addf %7, %9 : vector<32x16xf32>
    %11 = math.tanh %10 : vector<32x16xf32>
    %cst_9 = arith.constant dense<0.000000e+00> : vector<32x16xf32>
    %12 = tpu.matmul %11, %0, %cst_9 {dimension_numbers = #tpu.dot_dimension_numbers<[1], [0], [0], [1], [0, 0, 1, 1], [], []>} : vector<32x16xf32>, vector<16x16xf32>, vector<32x16xf32> -> vector<32x16xf32>
    %c64 = arith.constant 64 : index
    %c0_10 = arith.constant 0 : index
    %13 = vector.load %arg4[%c64, %c0_10] : memref<328x128xf32, #tpu.memory_space<vmem>>, vector<32x32xf32>
    %cst_11 = arith.constant dense<0.000000e+00> : vector<32x16xf32>
    %14 = tpu.matmul %13, %12, %cst_11 {dimension_numbers = #tpu.dot_dimension_numbers<[1], [0], [0], [1], [0, 0, 1, 1], [], []>} : vector<32x32xf32>, vector<32x16xf32>, vector<32x16xf32> -> vector<32x16xf32>
    %c96 = arith.constant 96 : index
    %c0_12 = arith.constant 0 : index
    %15 = vector.load %arg4[%c96, %c0_12] : memref<328x128xf32, #tpu.memory_space<vmem>>, vector<32x32xf32>
    %cst_13 = arith.constant dense<0.000000e+00> : vector<32x16xf32>
    %16 = tpu.matmul %15, %11, %cst_13 {dimension_numbers = #tpu.dot_dimension_numbers<[1], [0], [0], [1], [0, 0, 1, 1], [], []>} : vector<32x32xf32>, vector<32x16xf32>, vector<32x16xf32> -> vector<32x16xf32>
    %17 = arith.addf %14, %16 : vector<32x16xf32>
    %c248 = arith.constant 248 : index
    %c0_14 = arith.constant 0 : index
    %18 = vector.load %arg4[%c248, %c0_14] : memref<328x128xf32, #tpu.memory_space<vmem>>, vector<32x1xf32>
    %19 = vector.broadcast %18 : vector<32x1xf32> to vector<32x16xf32>
    %20 = arith.addf %17, %19 : vector<32x16xf32>
    %21 = math.tanh %20 : vector<32x16xf32>
    %cst_15 = arith.constant dense<0.000000e+00> : vector<32x16xf32>
    %22 = tpu.matmul %21, %0, %cst_15 {dimension_numbers = #tpu.dot_dimension_numbers<[1], [0], [0], [1], [0, 0, 1, 1], [], []>} : vector<32x16xf32>, vector<16x16xf32>, vector<32x16xf32> -> vector<32x16xf32>
    %c128 = arith.constant 128 : index
    %c0_16 = arith.constant 0 : index
    %23 = vector.load %arg4[%c128, %c0_16] : memref<328x128xf32, #tpu.memory_space<vmem>>, vector<32x32xf32>
    %cst_17 = arith.constant dense<0.000000e+00> : vector<32x16xf32>
    %24 = tpu.matmul %23, %22, %cst_17 {dimension_numbers = #tpu.dot_dimension_numbers<[1], [0], [0], [1], [0, 0, 1, 1], [], []>} : vector<32x32xf32>, vector<32x16xf32>, vector<32x16xf32> -> vector<32x16xf32>
    %c160 = arith.constant 160 : index
    %c0_18 = arith.constant 0 : index
    %25 = vector.load %arg4[%c160, %c0_18] : memref<328x128xf32, #tpu.memory_space<vmem>>, vector<32x32xf32>
    %cst_19 = arith.constant dense<0.000000e+00> : vector<32x16xf32>
    %26 = tpu.matmul %25, %21, %cst_19 {dimension_numbers = #tpu.dot_dimension_numbers<[1], [0], [0], [1], [0, 0, 1, 1], [], []>} : vector<32x32xf32>, vector<32x16xf32>, vector<32x16xf32> -> vector<32x16xf32>
    %27 = arith.addf %24, %26 : vector<32x16xf32>
    %c280 = arith.constant 280 : index
    %c0_20 = arith.constant 0 : index
    %28 = vector.load %arg4[%c280, %c0_20] : memref<328x128xf32, #tpu.memory_space<vmem>>, vector<32x1xf32>
    %29 = vector.broadcast %28 : vector<32x1xf32> to vector<32x16xf32>
    %30 = arith.addf %27, %29 : vector<32x16xf32>
    %c192 = arith.constant 192 : index
    %c0_21 = arith.constant 0 : index
    %31 = vector.load %arg4[%c192, %c0_21] : memref<328x128xf32, #tpu.memory_space<vmem>>, vector<1x32xf32>
    %cst_22 = arith.constant dense<0.000000e+00> : vector<1x16xf32>
    %32 = tpu.matmul %31, %22, %cst_22 {dimension_numbers = #tpu.dot_dimension_numbers<[1], [0], [0], [1], [0, 0, 1, 1], [], []>} : vector<1x32xf32>, vector<32x16xf32>, vector<1x16xf32> -> vector<1x16xf32>
    %c200 = arith.constant 200 : index
    %c0_23 = arith.constant 0 : index
    %33 = vector.load %arg4[%c200, %c0_23] : memref<328x128xf32, #tpu.memory_space<vmem>>, vector<1x32xf32>
    %cst_24 = arith.constant dense<0.000000e+00> : vector<1x16xf32>
    %34 = tpu.matmul %33, %21, %cst_24 {dimension_numbers = #tpu.dot_dimension_numbers<[1], [0], [0], [1], [0, 0, 1, 1], [], []>} : vector<1x32xf32>, vector<32x16xf32>, vector<1x16xf32> -> vector<1x16xf32>
    %35 = arith.addf %32, %34 : vector<1x16xf32>
    %c312 = arith.constant 312 : index
    %c0_25 = arith.constant 0 : index
    %36 = vector.load %arg4[%c312, %c0_25] : memref<328x128xf32, #tpu.memory_space<vmem>>, vector<1x1xf32>
    %37 = vector.broadcast %36 : vector<1x1xf32> to vector<1x16xf32>
    %38 = arith.addf %35, %37 : vector<1x16xf32>
    %c0_26 = arith.constant 0 : index
    %c0_27 = arith.constant 0 : index
    %39 = vector.load %arg2[%c0_26, %c0_27] : memref<1x16xf32, #tpu.memory_space<vmem>>, vector<1x16xf32>
    %cst_28 = arith.constant 0.000000e+00 : f32
    %40 = vector.broadcast %cst_28 : f32 to vector<1x16xf32>
    %41 = arith.cmpf ogt, %39, %40 : vector<1x16xf32>
    %cst_29 = arith.constant -1.000000e+30 : f32
    %42 = vector.broadcast %cst_29 : f32 to vector<1x16xf32>
    %43 = arith.select %41, %38, %42 : vector<1x16xi1>, vector<1x16xf32>
    %cst_30 = arith.constant dense<0xFF800000> : vector<1xf32>
    %44 = vector.multi_reduction <maximumf>, %43, %cst_30 [1] : vector<1x16xf32> to vector<1xf32>
    %45 = vector.shape_cast %44 : vector<1xf32> to vector<1x1xf32>
    %46 = vector.broadcast %45 : vector<1x1xf32> to vector<1x16xf32>
    %47 = arith.subf %38, %46 : vector<1x16xf32>
    %48 = math.exp %47 : vector<1x16xf32>
    %cst_31 = arith.constant 0.000000e+00 : f32
    %49 = vector.broadcast %cst_31 : f32 to vector<1x16xf32>
    %50 = arith.select %41, %48, %49 : vector<1x16xi1>, vector<1x16xf32>
    %cst_32 = arith.constant dense<0.000000e+00> : vector<1xf32>
    %51 = vector.multi_reduction <add>, %50, %cst_32 [1] : vector<1x16xf32> to vector<1xf32>
    %52 = vector.shape_cast %51 : vector<1xf32> to vector<1x1xf32>
    %53 = vector.broadcast %45 : vector<1x1xf32> to vector<1x16xf32>
    %54 = arith.subf %38, %53 : vector<1x16xf32>
    %55 = math.log %52 : vector<1x1xf32>
    %56 = vector.broadcast %55 : vector<1x1xf32> to vector<1x16xf32>
    %57 = arith.subf %54, %56 : vector<1x16xf32>
    %cst_33 = arith.constant 0xFF800000 : f32
    %58 = vector.broadcast %cst_33 : f32 to vector<1x16xf32>
    %59 = arith.select %41, %57, %58 : vector<1x16xi1>, vector<1x16xf32>
    %c0_34 = arith.constant 0 : index
    %c0_35 = arith.constant 0 : index
    %60 = vector.load %arg5[%c0_34, %c0_35] : memref<1x16xf32, #tpu.memory_space<vmem>>, vector<1x16xf32>
    tpu.vector_store %arg5[%c0_34, %c0_35], %59 {strides = array<i32>} : memref<1x16xf32, #tpu.memory_space<vmem>>, vector<1x16xf32>,
    %c0_36 = arith.constant 0 : index
    %c0_37 = arith.constant 0 : index
    %61 = vector.load %arg3[%c0_36, %c0_37] : memref<16x2xf32, #tpu.memory_space<vmem>>, vector<16x2xf32>
    %cst_38 = arith.constant dense<0.000000e+00> : vector<32x2xf32>
    %62 = tpu.matmul %30, %61, %cst_38 {dimension_numbers = #tpu.dot_dimension_numbers<[1], [0], [0], [1], [0, 0, 1, 1], [], []>} : vector<32x16xf32>, vector<16x2xf32>, vector<32x2xf32> -> vector<32x2xf32>
    %c208 = arith.constant 208 : index
    %c0_39 = arith.constant 0 : index
    %63 = vector.load %arg4[%c208, %c0_39] : memref<328x128xf32, #tpu.memory_space<vmem>>, vector<1x32xf32>
    %cst_40 = arith.constant dense<0.000000e+00> : vector<1x2xf32>
    %64 = tpu.matmul %63, %62, %cst_40 {dimension_numbers = #tpu.dot_dimension_numbers<[1], [0], [0], [1], [0, 0, 1, 1], [], []>} : vector<1x32xf32>, vector<32x2xf32>, vector<1x2xf32> -> vector<1x2xf32>
    %c320 = arith.constant 320 : index
    %c0_41 = arith.constant 0 : index
    %65 = vector.load %arg4[%c320, %c0_41] : memref<328x128xf32, #tpu.memory_space<vmem>>, vector<1x1xf32>
    %66 = vector.broadcast %65 : vector<1x1xf32> to vector<1x2xf32>
    %67 = arith.addf %64, %66 : vector<1x2xf32>
    %68 = math.tanh %67 : vector<1x2xf32>
    %c0_42 = arith.constant 0 : index
    %c0_43 = arith.constant 0 : index
    %69 = vector.load %arg6[%c0_42, %c0_43] : memref<1x2xf32, #tpu.memory_space<vmem>>, vector<1x2xf32>
    tpu.vector_store %arg6[%c0_42, %c0_43], %68 {strides = array<i32>} : memref<1x2xf32, #tpu.memory_space<vmem>>, vector<1x2xf32>,
    return
  }
}

</mosaic_0001>

<bundles_post_ra>
// kernel: tpu_custom_call.1
= control target key start
LH: loop header
LB: loop body
LE: loop exit
PB: predicated region body
PF: predicated region fallthrough
CT: control target
= control target key end

     0   :  { %12 = vsyncpa [#allocation3], 0  ;;  %s1006_s0 = inlined_call_operand.vmem [shape: f32[16,16], index: 0, kind: input, shape index: {}]   ;;  %s1007_s1 = inlined_call_operand.hbm [shape: f32[8,16], index: 1, kind: input, shape index: {}]   ;;  %s1008_s2 = inlined_call_operand.vmem [shape: f32[1,16], index: 2, kind: input, shape index: {}]   ;;  %s1009_s3 = inlined_call_operand.vmem [shape: f32[16,2], index: 3, kind: input, shape index: {}]   ;;  %s1010_s4 = inlined_call_operand.hbm [shape: f32[328,128], index: 4, kind: input, shape index: {}]   ;;  %s1011_s5 = inlined_call_operand.hbm [shape: f32[1,16], index: 5, kind: output, shape index: {0}]   ;;  %s1012_s6 = inlined_call_operand.hbm [shape: f32[1,2], index: 6, kind: output, shape index: {1}]  }
   0x1   :  { %13 = vsyncpa [#allocation6], 0 }
   0x2   :  { %14 = vsyncpa [#allocation4], 0 }
   0x3   :  { %15 = vsyncpa [#allocation9], 0  ;;  %s23_s23 = sshll.u32 %s1007_s1, 4  ;;  %s891_s24 = smov [#allocation2]   ;;  %s24_s23 = int_to_ptr.hbm [resolvable:$true] %s23_s23 }
   0x4   :  { %s25_s25 = sshll.u32 %s891_s24, 4  ;;  %s37_s28 = sshll.u32 %s1010_s4, 4  ;;  %s26_s25 = int_to_ptr.vmem [resolvable:$true] %s25_s25  ;;  %s38_s28 = int_to_ptr.hbm [resolvable:$true] %s37_s28 }
   0x5   :  { %28 = dma.hbm_to_vmem [thread:$0]  %s24_s23, 128, %s26_s25, [#allocation3]  }
   0x6   :  { %s892_s29 = smov [#allocation5]   ;;  %s893_s7 = smov 128  }
   0x7   :  { %s39_s30 = sshll.u32 %s892_s29, 4  ;;  %s894_s8 = smov 8   ;;  %s40_s30 = int_to_ptr.vmem [resolvable:$true] %s39_s30 }
   0x8   :  { %45 = dma.hbm_to_vmem [thread:$0]  %s38_s28, 5248, %s40_s30, [#allocation6], %s893_s7, %s893_s7, %s894_s8  }
   0x9   :  { %883 = dma.done.wait [#allocation3], 128  }
   0xa   :  { %884 = vsyncadd [#allocation3], 4294967168 }
   0xb   :  { %885 = dma.done.wait [#allocation6], 5248  }
   0xc   :  { %886 = vsyncadd [#allocation6], 4294962048  ;;  %v895_v0 = vmov 0   ;;  %v55_v1 = vld [vmem:[%s1006_s0 + $0x8] sm:$0xff]  ;;  %v54_v2 = vld [vmem:[%s1006_s0] sm:$0xff]  ;;  %vm57_vm0 = vcmask 130048  }
   0xd   :  { %762 = vset.pattern.permute.xlu0 %v895_v0  ;;  %763 = vset.pattern.permute.xlu1 %v895_v0  ;;  %v56_v3 = vld [vmem:[#allocation2] sm:$0xff]  ;;  %v174_v4 = vld [vmem:[#allocation5 + $0xe8] sm:$0xff]  ;;  %vm89_vm1 = vcmask 64512   ;;  %v175_v5 = vld [vmem:[#allocation5 + $0xf0] sm:$0xff]  ;;  %vm253_vm2 = vcmask 261120   ;;  %vm585_vm4 = vcmask 122880  }
   0xe   :  { %764 = vset.pattern.permute.xlu2 %v895_v0  ;;  %75 = vmatpush.msra.mxu0 %v55_v1  ;;  %v85_v6 = vld [vmem:[#allocation5 + $0x20] sm:$0xff]  ;;  %v338_v7 = vld [vmem:[#allocation5 + $0x108] sm:$0xff]  ;;  %v172_v11 = vld [vmem:[#allocation5 + $0xd8] sm:$0xff]  ;;  %s684_s18 = sshll.u32 %s1011_s5, 4  ;;  %s897_s19 = smov [#allocation8]   ;;  %vm675_vm5 = vcmask 8192   ;;  %s685_s18 = int_to_ptr.hbm [resolvable:$true] %s684_s18 }
   0xf   :  { %117 = vmatpush.msra.mxu1 %v56_v3  ;;  %188 = vperm.xlu0 %762, %v174_v4   ;;  %v173_v8 = vld [vmem:[#allocation5 + $0xe0] sm:$0xff]  ;;  %v86_v9 = vld [vmem:[#allocation5 + $0x28] sm:$0xff]  ;;  %v87_v12 = vld [vmem:[#allocation5 + $0x30] sm:$0xff]  ;;  %s693_s20 = sshll.u32 %s897_s19, 4  ;;  %s695_s23 = sshll.u32 %s1012_s6, 4  ;;  %s694_s20 = int_to_ptr.vmem [resolvable:$true] %s693_s20  ;;  %s696_s23 = int_to_ptr.hbm [resolvable:$true] %s695_s23 }
  0x10   :  { %752 = vmatpush.msra.mxu3 %v55_v1  ;;  %76 = vmatpush.msra.mxu0 %v54_v2  ;;  %v500_v10 = vld [vmem:[#allocation5 + $0x120] sm:$0xff]  ;;  %v575_v13 = vld [vmem:[#allocation5 + $0x138] sm:$0x1]  ;;  %v339_v15 = vld [vmem:[#allocation5 + $0x110] sm:$0xff] }
  0x11   :  { %711 = vmatmul.msk.f32.vlgmr.msra.gmra.mxu0 %vm57_vm0, %v56_v3  ;;  %712 = vmatmul.msk.f32.vlgmr.msra.gmra.mxu1 %vm89_vm1, %v85_v6  ;;  %v88_v14 = vld [vmem:[#allocation5 + $0x38] sm:$0xff]  ;;  %v81_v16 = vld [vmem:[#allocation5] sm:$0xff]  ;;  %v501_v19 = vld [vmem:[#allocation5 + $0x128] sm:$0xff] }
  0x12   :  { %754 = vmatpush.msra.mxu3 %v54_v2  ;;  %230 = vmatpush.msrb.mxu0 %v55_v1  ;;  %v645_v18 = vld [vmem:[#allocation5 + $0x140] sm:$0x1]  ;;  %v82_v20 = vld [vmem:[#allocation5 + $0x8] sm:$0xff]  ;;  %v83_v21 = vld [vmem:[#allocation5 + $0x10] sm:$0xff] }
  0x13   :  { %183 = vperm.xlu1 %763, %v173_v8   ;;  %v84_v22 = vld [vmem:[#allocation5 + $0x18] sm:$0xff]  ;;  %v249_v47 = vld [vmem:[#allocation5 + $0x60] sm:$0xff]  ;;  %v250_v48 = vld [vmem:[#allocation5 + $0x68] sm:$0xff] }
  0x14   :  { %231 = vmatpush.msrb.mxu0 %v54_v2  ;;  %v336_v49 = vld [vmem:[#allocation5 + $0xf8] sm:$0xff]  ;;  %v251_v50 = vld [vmem:[#allocation5 + $0x70] sm:$0xff]  ;;  %v337_v52 = vld [vmem:[#allocation5 + $0x100] sm:$0xff] }
  0x15   :  { %342 = vperm.xlu2 %764, %v336_v49   ;;  %v252_v53 = vld [vmem:[#allocation5 + $0x78] sm:$0xff]  ;;  %v245_v57 = vld [vmem:[#allocation5 + $0x40] sm:$0xff]  ;;  %v502_v59 = vld [vmem:[#allocation5 + $0x130] sm:$0xff] }
  0x16   :  { %v499_v55 = vld [vmem:[#allocation5 + $0x118] sm:$0xff]  ;;  %v246_v60 = vld [vmem:[#allocation5 + $0x48] sm:$0xff]  ;;  %v247_v61 = vld [vmem:[#allocation5 + $0x50] sm:$0xff] }
  0x17   :  { %193 = vperm.xlu0 %762, %v175_v5   ;;  %v248_v62 = vld [vmem:[#allocation5 + $0x58] sm:$0xff] }
  0x19   :  { %713 = vmatmul.msk.f32.gmra.mxu1 %vm89_vm1, %v86_v9 }
  0x1b   :  { %178 = vperm.xlu1 %763, %v172_v11  }
  0x1d   :  { %347 = vperm.xlu2 %764, %v337_v52  }
  0x1f   :  { %352 = vperm.xlu0 %762, %v338_v7  }
  0x21   :  { %714 = vmatmul.msk.f32.gmra.mxu1 %vm89_vm1, %v87_v12 }
  0x23   :  { %357 = vperm.xlu1 %763, %v339_v15  }
  0x25   :  { %505 = vperm.xlu2 %764, %v499_v55  }
  0x27   :  { %510 = vperm.xlu0 %762, %v500_v10  }
  0x29   :  { %715 = vmatmul.msk.f32.gmra.mxu1 %vm89_vm1, %v88_v14 }
  0x2b   :  { %515 = vperm.xlu1 %763, %v501_v19  }
  0x2d   :  { %520 = vperm.xlu2 %764, %v502_v59  }
  0x2f   :  { %578 = vperm.xlu0 %762, %v575_v13  }
  0x37   :  { %648 = vperm.xlu0 %762, %v645_v18  }
  0x6f   :  { %v343_v0 = vpop.permute.xlu2 %342 }
  0x77   :  { %v348_v7 = vpop.permute.xlu2 %347 }
  0x81   :  { %v189_v35 = vpop.permute.xlu0 %188 }
  0x85   :  { %v184_v23 = vpop.permute.xlu1 %183 }
  0x89   :  { %v194_v43 = vpop.permute.xlu0 %193 }
  0x8d   :  { %v179_v26 = vpop.permute.xlu1 %178 }
  0x8e   :  { %v78_v17 = vpop.f32.mrf.mxu0  ;;  %v119_v24 = vpop.f32.mrf.mxu1 }
  0x8f   :  { %158 = vmatpush.msra.mxu2 %v78_v17 }
  0x90   :  { %716 = vmatmul.msk.f32.vlgmr.msra.gmra.mxu2 %vm89_vm1, %v81_v16 }
  0x91   :  { %751 = vmatpush.msrb.mxu2 %v55_v1  ;;  %v353_v13 = vpop.permute.xlu0 %352 }
  0x93   :  { %753 = vmatpush.msrb.mxu2 %v54_v2 }
  0x95   :  { %394 = vmatpush.msra.mxu2 %v55_v1  ;;  %v358_v19 = vpop.permute.xlu1 %357 }
  0x96   :  { %v122_v28 = vpop.f32.mrf.mxu1 }
  0x97   :  { %395 = vmatpush.msra.mxu2 %v54_v2 }
  0x98   :  { %717 = vmatmul.msk.f32.gmra.mxu2 %vm89_vm1, %v82_v20 }
  0x9e   :  { %v125_v34 = vpop.f32.mrf.mxu1 }
  0xa0   :  { %718 = vmatmul.msk.f32.gmra.mxu2 %vm89_vm1, %v83_v21 }
  0xa6   :  { %v128_v40 = vpop.f32.mrf.mxu1 }
  0xa8   :  { %719 = vmatmul.msk.f32.gmra.mxu2 %vm89_vm1, %v84_v22 }
 0x113   :  { %v160_v25 = vpop.f32.mrf.mxu2 }
 0x114   :  { %v161_v27 = vadd.f32 %v160_v25, %v119_v24  ;;  %v414_v25 = vld [vmem:[#allocation5 + $0xa8] sm:$0xff] }
 0x116   :  { %v196_v29 = vadd.f32 %v179_v26, %v161_v27  ;;  %v528_v26 = vld [vmem:[#allocation5 + $0xc8] sm:$0x1] }
 0x118   :  { %765 = vtanh.f32 %v196_v29 }
 0x11b   :  { %v163_v30 = vpop.f32.mrf.mxu2 }
 0x11c   :  { %v164_v31 = vadd.f32 %v163_v30, %v122_v28  ;;  %v415_v28 = vld [vmem:[#allocation5 + $0xb0] sm:$0xff]  ;;  %v416_v30 = vld [vmem:[#allocation5 + $0xb8] sm:$0xff] }
 0x11e   :  { %v766_v32 = vpop.eup %765  ;;  %v197_v33 = vadd.f32 %v184_v23, %v164_v31  ;;  %v413_v23 = vld [vmem:[#allocation5 + $0xa0] sm:$0xff] }
 0x11f   :  { %720 = vmatmul.msk.f32.vlgmr.msrb.gmra.mxu0 %vm57_vm0, %v766_v32 }
 0x120   :  { %767 = vtanh.f32 %v197_v33  ;;  %v409_v33 = vld [vmem:[#allocation5 + $0x80] sm:$0xff] }
 0x123   :  { %v166_v36 = vpop.f32.mrf.mxu2 }
 0x124   :  { %v167_v37 = vadd.f32 %v166_v36, %v125_v34  ;;  %v527_v34 = vld [vmem:[#allocation5 + $0xc0] sm:$0x1]  ;;  %v411_v36 = vld [vmem:[#allocation5 + $0x90] sm:$0xff] }
 0x126   :  { %v768_v38 = vpop.eup %767  ;;  %v198_v39 = vadd.f32 %v189_v35, %v167_v37  ;;  %v410_v35 = vld [vmem:[#allocation5 + $0x88] sm:$0xff]  ;;  %v412_v37 = vld [vmem:[#allocation5 + $0x98] sm:$0xff] }
 0x127   :  { %721 = vmatmul.msk.f32.vlgmr.msrb.gmra.mxu2 %vm57_vm0, %v768_v38 }
 0x128   :  { %769 = vtanh.f32 %v198_v39 }
 0x12b   :  { %v169_v41 = vpop.f32.mrf.mxu2 }
 0x12c   :  { %v170_v42 = vadd.f32 %v169_v41, %v128_v40  ;;  %v511_v40 = vpop.permute.xlu0 %510 }
 0x12e   :  { %v770_v44 = vpop.eup %769  ;;  %v199_v45 = vadd.f32 %v194_v43, %v170_v42  ;;  %v506_v43 = vpop.permute.xlu2 %505 }
 0x12f   :  { %722 = vmatmul.msk.f32.vlgmr.msra.gmra.mxu3 %vm57_vm0, %v770_v44 }
 0x130   :  { %771 = vtanh.f32 %v199_v45 }
 0x136   :  { %v772_v46 = vpop.eup %771 }
 0x137   :  { %723 = vmatmul.msk.f32.gmra.mxu3 %vm57_vm0, %v772_v46  ;;  %278 = vmatpush.msra.mxu0 %v772_v46 }
 0x139   :  { %279 = vmatpush.msra.mxu0 %v770_v44 }
 0x13b   :  { %280 = vmatpush.msra.mxu0 %v768_v38  ;;  %v601_v38 = vld [vmem:[%s1009_s3] sm:$0xff] }
 0x13d   :  { %281 = vmatpush.msra.mxu0 %v766_v32  ;;  %v602_v32 = vld [vmem:[%s1009_s3 + $0x8] sm:$0xff] }
 0x13e   :  { %724 = vmatmul.msk.f32.vlgmr.msra.gmra.mxu0 %vm253_vm2, %v249_v47  ;;  %v582_v47 = vld [vmem:[%s1008_s2] sm:$0x1]  ;;  %s896_s2 = smov [#allocation7]  }
 0x13f   :  { %vm583_vm3 = vcmp.gt.f32.partialorder %v582_v47, 0.0  ;;  %s682_s3 = sshll.u32 %s896_s2, 4  ;;  %s683_s3 = int_to_ptr.vmem [resolvable:$true] %s682_s3 }
 0x146   :  { %725 = vmatmul.msk.f32.gmra.mxu0 %vm253_vm2, %v250_v48 }
 0x14e   :  { %726 = vmatmul.msk.f32.gmra.mxu0 %vm253_vm2, %v251_v50  ;;  %v579_v50 = vpop.permute.xlu0 %578 }
 0x156   :  { %727 = vmatmul.msk.f32.gmra.mxu0 %vm253_vm2, %v252_v53 }
 0x19c   :  { %v233_v58 = vpop.f32.mrf.mxu0 }
 0x1aa   :  { %v236_v56 = vpop.f32.mrf.mxu2 }
 0x1b2   :  { %v239_v51 = vpop.f32.mrf.mxu3 }
 0x1ba   :  { %v242_v54 = vpop.f32.mrf.mxu3 }
 0x1bb   :  { %319 = vmatpush.msrb.mxu1 %v242_v54  ;;  %v283_v63 = vpop.f32.mrf.mxu0 }
 0x1bd   :  { %320 = vmatpush.msrb.mxu1 %v239_v51 }
 0x1bf   :  { %321 = vmatpush.msrb.mxu1 %v236_v56 }
 0x1c1   :  { %322 = vmatpush.msrb.mxu1 %v233_v58 }
 0x1c2   :  { %728 = vmatmul.msk.f32.vlgmr.msrb.gmra.mxu1 %vm253_vm2, %v245_v57 }
 0x1c3   :  { %v286_v3 = vpop.f32.mrf.mxu0 }
 0x1ca   :  { %729 = vmatmul.msk.f32.gmra.mxu1 %vm253_vm2, %v246_v60  ;;  %v516_v60 = vpop.permute.xlu1 %515 }
 0x1cb   :  { %v289_v10 = vpop.f32.mrf.mxu0 }
 0x1d2   :  { %730 = vmatmul.msk.f32.gmra.mxu1 %vm253_vm2, %v247_v61 }
 0x1d3   :  { %v292_v16 = vpop.f32.mrf.mxu0 }
 0x1da   :  { %731 = vmatmul.msk.f32.gmra.mxu1 %vm253_vm2, %v248_v62 }
 0x23f   :  { %v324_v1 = vpop.f32.mrf.mxu1 }
 0x240   :  { %v325_v2 = vadd.f32 %v324_v1, %v283_v63  ;;  %v521_v1 = vpop.permute.xlu2 %520 }
 0x242   :  { %v360_v4 = vadd.f32 %v343_v0, %v325_v2 }
 0x244   :  { %773 = vtanh.f32 %v360_v4 }
 0x247   :  { %v327_v5 = vpop.f32.mrf.mxu1 }
 0x248   :  { %v328_v6 = vadd.f32 %v327_v5, %v286_v3 }
 0x24a   :  { %v774_v8 = vpop.eup %773  ;;  %v361_v9 = vadd.f32 %v348_v7, %v328_v6 }
 0x24b   :  { %732 = vmatmul.msk.f32.vlgmr.msra.gmra.mxu2 %vm57_vm0, %v774_v8 }
 0x24c   :  { %775 = vtanh.f32 %v361_v9 }
 0x24f   :  { %v330_v11 = vpop.f32.mrf.mxu1 }
 0x250   :  { %v331_v12 = vadd.f32 %v330_v11, %v289_v10 }
 0x252   :  { %v776_v14 = vpop.eup %775  ;;  %v362_v15 = vadd.f32 %v353_v13, %v331_v12  ;;  %v644_v13 = vld [vmem:[#allocation5 + $0xd0] sm:$0x1] }
 0x253   :  { %733 = vmatmul.msk.f32.gmra.mxu2 %vm57_vm0, %v776_v14 }
 0x254   :  { %777 = vtanh.f32 %v362_v15 }
 0x257   :  { %v333_v17 = vpop.f32.mrf.mxu1 }
 0x258   :  { %v334_v18 = vadd.f32 %v333_v17, %v292_v16 }
 0x25a   :  { %v778_v20 = vpop.eup %777  ;;  %v363_v21 = vadd.f32 %v358_v19, %v334_v18  ;;  %v649_v19 = vpop.permute.xlu0 %648 }
 0x25b   :  { %734 = vmatmul.msk.f32.gmra.mxu2 %vm57_vm0, %v778_v20 }
 0x25c   :  { %779 = vtanh.f32 %v363_v21 }
 0x262   :  { %v780_v22 = vpop.eup %779 }
 0x263   :  { %735 = vmatmul.msk.f32.gmra.mxu2 %vm57_vm0, %v780_v22  ;;  %441 = vmatpush.msrb.mxu3 %v780_v22 }
 0x264   :  { %544 = vmatpush.msra.mxu1 %v780_v22 }
 0x265   :  { %442 = vmatpush.msrb.mxu3 %v778_v20 }
 0x266   :  { %545 = vmatpush.msra.mxu1 %v778_v20 }
 0x267   :  { %443 = vmatpush.msrb.mxu3 %v776_v14 }
 0x268   :  { %546 = vmatpush.msra.mxu1 %v776_v14 }
 0x269   :  { %444 = vmatpush.msrb.mxu3 %v774_v8 }
 0x26a   :  { %547 = vmatpush.msra.mxu1 %v774_v8  ;;  %736 = vmatmul.msk.f32.vlgmr.msrb.gmra.mxu3 %vm253_vm2, %v413_v23 }
 0x26b   :  { %744 = vmatmul.msk.f32.vlgmr.msra.gmra.mxu1 %vm253_vm2, %v528_v26  ;;  %629 = vmatpush.msra.mxu3 %v602_v32 }
 0x26d   :  { %630 = vmatpush.msra.mxu3 %v601_v38 }
 0x272   :  { %737 = vmatmul.msk.f32.gmra.mxu3 %vm253_vm2, %v414_v25 }
 0x27a   :  { %738 = vmatmul.msk.f32.gmra.mxu3 %vm253_vm2, %v415_v28 }
 0x282   :  { %739 = vmatmul.msk.f32.gmra.mxu3 %vm253_vm2, %v416_v30 }
 0x2ce   :  { %v397_v24 = vpop.f32.mrf.mxu2 }
 0x2d6   :  { %v400_v27 = vpop.f32.mrf.mxu2 }
 0x2de   :  { %v403_v29 = vpop.f32.mrf.mxu2 }
 0x2e6   :  { %v406_v31 = vpop.f32.mrf.mxu2 }
 0x2e7   :  { %482 = vmatpush.msrb.mxu0 %v406_v31  ;;  %567 = vmatpush.msrb.mxu2 %v406_v31 }
 0x2e8   :  { %v549_v46 = vpop.f32.mrf.mxu1 }
 0x2e9   :  { %483 = vmatpush.msrb.mxu0 %v403_v29  ;;  %568 = vmatpush.msrb.mxu2 %v403_v29 }
 0x2eb   :  { %484 = vmatpush.msrb.mxu0 %v400_v27  ;;  %569 = vmatpush.msrb.mxu2 %v400_v27 }
 0x2ed   :  { %485 = vmatpush.msrb.mxu0 %v397_v24  ;;  %570 = vmatpush.msrb.mxu2 %v397_v24  ;;  %v446_v39 = vpop.f32.mrf.mxu3 }
 0x2ee   :  { %740 = vmatmul.msk.f32.vlgmr.msrb.gmra.mxu0 %vm253_vm2, %v409_v33  ;;  %745 = vmatmul.msk.f32.vlgmr.msrb.gmra.mxu2 %vm253_vm2, %v527_v34 }
 0x2f5   :  { %v449_v44 = vpop.f32.mrf.mxu3 }
 0x2f6   :  { %741 = vmatmul.msk.f32.gmra.mxu0 %vm253_vm2, %v410_v35 }
 0x2fd   :  { %v452_v57 = vpop.f32.mrf.mxu3 }
 0x2fe   :  { %742 = vmatmul.msk.f32.gmra.mxu0 %vm253_vm2, %v411_v36 }
 0x305   :  { %v455_v62 = vpop.f32.mrf.mxu3 }
 0x306   :  { %743 = vmatmul.msk.f32.gmra.mxu0 %vm253_vm2, %v412_v37 }
 0x36b   :  { %v487_v41 = vpop.f32.mrf.mxu0 }
 0x36c   :  { %v488_v42 = vadd.f32 %v487_v41, %v446_v39 }
 0x36e   :  { %v523_v45 = vadd.f32 %v506_v43, %v488_v42 }
 0x370   :  { %746 = vmatmul.msk.f32.vlgmr.msra.gmra.mxu3 %vm57_vm0, %v523_v45 }
 0x371   :  { %v572_v48 = vpop.f32.mrf.mxu2 }
 0x372   :  { %v573_v49 = vadd.f32 %v572_v48, %v549_v46 }
 0x373   :  { %v490_v51 = vpop.f32.mrf.mxu0 }
 0x374   :  { %v581_v52 = vadd.f32 %v579_v50, %v573_v49  ;;  %v491_v53 = vadd.f32 %v490_v51, %v449_v44 }
 0x376   :  { %v524_v54 = vadd.f32 %v511_v40, %v491_v53  ;;  %v584_v55 = vsel %vm583_vm3, %v581_v52, -1e+30 }
 0x377   :  { %v586_v56 = vsel %vm585_vm4, %v584_v55, -inf }
 0x378   :  { %587 = vmax.xlane.f32.xlu1 %v586_v56  ;;  %747 = vmatmul.msk.f32.gmra.mxu3 %vm57_vm0, %v524_v54 }
 0x37b   :  { %v493_v58 = vpop.f32.mrf.mxu0 }
 0x37c   :  { %v494_v59 = vadd.f32 %v493_v58, %v452_v57 }
 0x37e   :  { %v525_v61 = vadd.f32 %v516_v60, %v494_v59 }
 0x380   :  { %748 = vmatmul.msk.f32.gmra.mxu3 %vm57_vm0, %v525_v61 }
 0x383   :  { %v496_v63 = vpop.f32.mrf.mxu0 }
 0x384   :  { %v497_v0 = vadd.f32 %v496_v63, %v455_v62 }
 0x386   :  { %v526_v2 = vadd.f32 %v521_v1, %v497_v0 }
 0x388   :  { %749 = vmatmul.msk.f32.gmra.mxu3 %vm57_vm0, %v526_v2 }
 0x3eb   :  { %v588_v3 = vpop.xlane.xlu1 %587 }
 0x3ec   :  { %v589_v4 = vsub.f32 %v581_v52, %v588_v3 }
 0x3ee   :  { %v590_v5 = vmul.f32 1.442695, %v589_v4 }
 0x3f0   :  { %781 = vpow2.f32 %v590_v5 }
 0x3f3   :  { %v632_v6 = vpop.f32.mrf.mxu3 }
 0x3f6   :  { %v782_v7 = vpop.eup %781 }
 0x3f7   :  { %v592_v8 = vsel %vm583_vm3, %v782_v7, 0.0 }
 0x3f8   :  { %v593_v9 = vsel %vm585_vm4, %v592_v8, 0.0 }
 0x3f9   :  { %594 = vadd.xlane.f32.xlu2 %v593_v9 }
 0x3fb   :  { %v635_v10 = vpop.f32.mrf.mxu3 }
 0x403   :  { %v638_v11 = vpop.f32.mrf.mxu3 }
 0x40b   :  { %v641_v12 = vpop.f32.mrf.mxu3 }
 0x40c   :  { %666 = vmatpush.msrb.mxu1 %v641_v12 }
 0x40e   :  { %667 = vmatpush.msrb.mxu1 %v638_v11 }
 0x410   :  { %668 = vmatpush.msrb.mxu1 %v635_v10 }
 0x412   :  { %669 = vmatpush.msrb.mxu1 %v632_v6 }
 0x413   :  { %750 = vmatmul.msk.f32.vlgmr.msrb.gmra.mxu1 %vm253_vm2, %v644_v13 }
 0x46c   :  { %v595_v14 = vpop.xlane.xlu2 %594 }
 0x46d   :  { %783 = vlog2.f32 %v595_v14 }
 0x473   :  { %v784_v15 = vpop.eup %783 }
 0x474   :  { %v597_v16 = vmul.f32 0.6931472, %v784_v15 }
 0x476   :  { %v598_v17 = vsub.f32 %v589_v4, %v597_v16 }
 0x478   :  { %v599_v18 = vsel %vm583_vm3, %v598_v17, -inf }
 0x479   :  { %600 = vst.msk [vmem:[#allocation7] sm:$0x1] %vm585_vm4, %v599_v18 }
 0x47a   :  { %687 = dma.vmem_to_hbm [thread:$0]  %s683_s3, 16, %s685_s18, [#allocation4]  }
 0x490   :  { %v671_v20 = vpop.f32.mrf.mxu1 }
 0x491   :  { %v672_v21 = vadd.f32 %v671_v20, %v649_v19 }
 0x493   :  { %785 = vtanh.f32 %v672_v21 }
 0x499   :  { %v786_v22 = vpop.eup %785 }
 0x49a   :  { %676 = vst.msk [vmem:[#allocation8] sm:$0x1] %vm675_vm5, %v786_v22 }
 0x49b   :  { %698 = dma.vmem_to_hbm [thread:$0]  %s694_s20, 16, %s696_s23, [#allocation9]  }
 0x49c   :  { %887 = dma.done.wait [#allocation4], 16  }
 0x49d   :  { %888 = vsyncadd [#allocation4], 4294967280 }
 0x49e   :  { %889 = dma.done.wait [#allocation9], 16  }
 0x49f   :  { %890 = vsyncadd [#allocation9], 4294967280 }
 0x4a0   :  { %707 = vsyncpa [#allocation3], 1 }
 0x4a1   :  { %708 = vsyncpa [#allocation6], 1 }
 0x4a2   :  { %709 = vsyncpa [#allocation4], 1 }
 0x4a3   :  { %710 = vsyncpa [#allocation9], 1 }

</bundles_post_ra>
